<compile_context>
chip_gen: v7x
topology: tpu7x:2x2x1
jax: 0.10.0
libtpu: 0.0.40
codegen_flags: <defaults>
</compile_context>

<pallas_src>
import functools

import jax
import jax.numpy as jnp
from jax import lax
from jax.experimental import pallas as pl
from jax.experimental.pallas import tpu as pltpu


_LANE = 128


def _vmem_capacity_bytes():
    """Physical VMEM per TensorCore; conservative fallback if the query fails."""
    try:
        info = pltpu.get_tpu_info()
        cap = getattr(info, "vmem_capacity_bytes", None)
        if cap:
            return int(cap)
    except Exception:
        pass
    return 64 << 20  # v7x per-TC; the smallest of the supported generations


def _pick_block_h(h):
    """Hidden-axis tile: multiple of 128 when possible, >= 2 blocks when h allows
    (so the 'parallel' H axis can shard across v7x's two TensorCores)."""
    if h % _LANE != 0:
        return h
    bh = min(512, h)
    if h // bh < 2 and h > _LANE and h % (2 * _LANE) == 0:
        bh = h // 2
    return bh


def _finish_group_reduce(v, group_width):
    """v: (1, W) per-lane partial reductions where lanes are grouped in blocks of
    `group_width` that all belong to the same logical feature (row-folded layout).
    Sum across groups with XLU lane rotations; every lane ends with the full sum."""
    w = v.shape[-1]
    shift = group_width
    while shift < w:
        v = v + pltpu.roll(v, shift, axis=1)
        shift *= 2
    return v


# --------------------- Path A: single-pass kernel (whole N per block) ----------------

def _norm_cols_kernel(x_ref, w_ref, b_ref, ms_ref, o_ref, *, inv_n, eps, group_width):
    x = x_ref[...].astype(jnp.float32)                      # (Nf, bh)
    w = w_ref[...].astype(jnp.float32)                      # (1, bh)
    b = b_ref[...].astype(jnp.float32)
    ms = ms_ref[...].astype(jnp.float32)

    # One sweep: per-column sum and sum-of-squares (no (Nf, bh) `sub` temporary).
    s = jnp.sum(x, axis=0, keepdims=True)                   # (1, bh)
    sq = jnp.sum(x * x, axis=0, keepdims=True)
    if group_width is not None and group_width < s.shape[-1]:
        s = _finish_group_reduce(s, group_width)
        sq = _finish_group_reduce(sq, group_width)

    mean = s * inv_n
    ex2 = sq * inv_n
    m = mean * ms
    # E[(x - m)^2] = E[x^2] - 2*m*E[x] + m^2 ; clamp against cancellation rounding.
    var = jnp.maximum(ex2 - 2.0 * m * mean + m * m, 0.0)
    inv_std = lax.rsqrt(var + eps)

    # Fold the affine into a single scale/shift: out = x * scale + shift.
    scale = w * inv_std
    shift = b - scale * m
    o_ref[...] = (x * scale + shift).astype(o_ref.dtype)


def _norm_cols_single_pass(x, weight, bias, mean_scale, *, eps, n_samples,
                           group_width, bh, vmem_limit):
    nr, he = x.shape
    if group_width is not None:
        assert bh == he, "folded path requires the full (128-lane) width in one block"
    grid = (pl.cdiv(he, bh),)

    w2 = weight.reshape(1, he).astype(jnp.float32)
    b2 = bias.reshape(1, he).astype(jnp.float32)
    ms2 = mean_scale.reshape(1, he).astype(jnp.float32)

    kernel = functools.partial(_norm_cols_kernel, inv_n=1.0 / n_samples, eps=eps,
                               group_width=group_width)
    itemsize = x.dtype.itemsize
    cost = pl.CostEstimate(
        flops=int(5 * nr * he),
        transcendentals=int(he),
        bytes_accessed=int(2 * nr * he * itemsize + 3 * he * 4),
    )

    return pl.pallas_call(
        kernel,
        out_shape=jax.ShapeDtypeStruct((nr, he), x.dtype),
        grid_spec=pltpu.PrefetchScalarGridSpec(
            num_scalar_prefetch=0,
            grid=grid,
            in_specs=[
                pl.BlockSpec((nr, bh), lambda j: (0, j)),
                pl.BlockSpec((1, bh), lambda j: (0, j)),
                pl.BlockSpec((1, bh), lambda j: (0, j)),
                pl.BlockSpec((1, bh), lambda j: (0, j)),
            ],
            out_specs=pl.BlockSpec((nr, bh), lambda j: (0, j)),
        ),
        compiler_params=pltpu.CompilerParams(
            dimension_semantics=("parallel",),
            vmem_limit_bytes=int(vmem_limit)),
        cost_estimate=cost,
    )(x, w2, b2, ms2)


# --------------------- Path B: two-phase (N tiled) for large node counts -------------

def _stats_kernel(x_ref, w_ref, b_ref, ms_ref, ss_ref, sum_sc, sq_sc, *,
                  inv_n, eps, group_width, nb, n_rows, block_n, has_rem):
    n_idx = pl.program_id(1)

    @pl.when(n_idx == 0)
    def _():
        sum_sc[...] = jnp.zeros_like(sum_sc)
        sq_sc[...] = jnp.zeros_like(sq_sc)

    x = x_ref[...].astype(jnp.float32)                      # (block_n, bh)

    def accum(xv):
        sum_sc[...] = sum_sc[...] + jnp.sum(xv, axis=0, keepdims=True)
        sq_sc[...] = sq_sc[...] + jnp.sum(xv * xv, axis=0, keepdims=True)

    if has_rem:
        # Mask only the partial last N tile; full tiles accumulate unmasked.
        @pl.when(n_idx < nb - 1)
        def _():
            accum(x)

        @pl.when(n_idx == nb - 1)
        def _():
            row = lax.broadcasted_iota(jnp.int32, x.shape, 0) + n_idx * block_n
            accum(jnp.where(row < n_rows, x, 0.0))
    else:
        accum(x)

    @pl.when(n_idx == nb - 1)
    def _():
        s = sum_sc[...]
        sq = sq_sc[...]
        if group_width is not None and group_width < s.shape[-1]:
            s = _finish_group_reduce(s, group_width)
            sq = _finish_group_reduce(sq, group_width)
        mean = s * inv_n
        ex2 = sq * inv_n
        ms = ms_ref[...].astype(jnp.float32)
        w = w_ref[...].astype(jnp.float32)
        b = b_ref[...].astype(jnp.float32)
        m = mean * ms
        var = jnp.maximum(ex2 - 2.0 * m * mean + m * m, 0.0)
        inv_std = lax.rsqrt(var + eps)
        scale = w * inv_std
        shift = b - scale * m
        ss_ref[0:1, :] = scale
        ss_ref[1:2, :] = shift


def _apply_kernel(ss_ref, x_ref, o_ref):
    scale = ss_ref[0:1, :]                                  # (1, bh) f32
    shift = ss_ref[1:2, :]
    x = x_ref[...].astype(jnp.float32)
    o_ref[...] = (x * scale + shift).astype(o_ref.dtype)


def _norm_cols_two_phase(x, weight, bias, mean_scale, *, eps, n_samples,
                         group_width, block_n_stats=1024, block_n_apply=512):
    nr, he = x.shape
    bh = _pick_block_h(he)
    if group_width is not None:
        assert bh == he, "folded path requires the full (128-lane) width in one block"
    bn1 = min(block_n_stats, nr)
    bn2 = min(block_n_apply, nr)
    hb = pl.cdiv(he, bh)
    nb1 = pl.cdiv(nr, bn1)
    nb2 = pl.cdiv(nr, bn2)
    has_rem = (nr % bn1) != 0
    itemsize = x.dtype.itemsize

    w2 = weight.reshape(1, he).astype(jnp.float32)
    b2 = bias.reshape(1, he).astype(jnp.float32)
    ms2 = mean_scale.reshape(1, he).astype(jnp.float32)

    # Phase 1: per-column sum / sum-of-squares accumulated into VMEM scratch across
    # N tiles; at the last N tile fold in rsqrt + affine and emit (scale, shift).
    ss = pl.pallas_call(
        functools.partial(_stats_kernel, inv_n=1.0 / n_samples, eps=eps,
                          group_width=group_width, nb=nb1, n_rows=nr,
                          block_n=bn1, has_rem=has_rem),
        out_shape=jax.ShapeDtypeStruct((2, he), jnp.float32),
        grid_spec=pltpu.PrefetchScalarGridSpec(
            num_scalar_prefetch=0,
            grid=(hb, nb1),
            in_specs=[
                pl.BlockSpec((bn1, bh), lambda j, i: (i, j)),
                pl.BlockSpec((1, bh), lambda j, i: (0, j)),
                pl.BlockSpec((1, bh), lambda j, i: (0, j)),
                pl.BlockSpec((1, bh), lambda j, i: (0, j)),
            ],
            out_specs=pl.BlockSpec((2, bh), lambda j, i: (0, j)),
            scratch_shapes=[pltpu.VMEM((1, bh), jnp.float32),
                            pltpu.VMEM((1, bh), jnp.float32)],
        ),
        compiler_params=pltpu.CompilerParams(
            dimension_semantics=("parallel", "arbitrary")),
        cost_estimate=pl.CostEstimate(
            flops=int(3 * nr * he),
            transcendentals=int(he),
            bytes_accessed=int(nr * he * itemsize + 5 * he * 4)),
    )(x, w2, b2, ms2)

    # Phase 2: re-read x tiles, pure x * scale + shift (no per-tile rsqrt / params).
    out = pl.pallas_call(
        _apply_kernel,
        out_shape=jax.ShapeDtypeStruct((nr, he), x.dtype),
        grid_spec=pltpu.PrefetchScalarGridSpec(
            num_scalar_prefetch=0,
            grid=(hb, nb2),
            in_specs=[
                pl.BlockSpec((2, bh), lambda j, i: (0, j)),
                pl.BlockSpec((bn2, bh), lambda j, i: (i, j)),
            ],
            out_specs=pl.BlockSpec((bn2, bh), lambda j, i: (i, j)),
        ),
        compiler_params=pltpu.CompilerParams(
            dimension_semantics=("parallel", "parallel")),
        cost_estimate=pl.CostEstimate(
            flops=int(2 * nr * he),
            transcendentals=0,
            bytes_accessed=int(2 * nr * he * itemsize + 2 * he * 4)),
    )(ss, x)
    return out


# --------------------------------- Dispatcher ----------------------------------------

def _norm_cols(x, weight, bias, mean_scale, *, eps, force_two_phase=False):
    """Per-column (last-axis feature) normalization of a 2-D (N, H) array."""
    n, h = x.shape
    n_samples = n
    group_width = None
    folded = False

    # Lane-dense row folding for narrow feature dims: (N, H) -> (N/fold, 128) so
    # every store is a full-lane vst and no lanes are wasted (biggest measured lever).
    if h < _LANE and (_LANE % h == 0):
        fold = _LANE // h
        if n % fold == 0 and n >= fold:
            x = x.reshape(n // fold, _LANE)
            weight = jnp.tile(jnp.ravel(weight), fold)
            bias = jnp.tile(jnp.ravel(bias), fold)
            mean_scale = jnp.tile(jnp.ravel(mean_scale), fold)
            group_width = h
            folded = True

    nr, he = x.shape
    bh = _pick_block_h(he)
    itemsize = x.dtype.itemsize
    cap = _vmem_capacity_bytes()
    # Generation-aware single-pass budget (leave headroom under physical VMEM).
    budget = min(cap * 3 // 8, 48 << 20)
    # Double-buffered input + output blocks plus in-kernel f32 upcast temporaries.
    footprint = 4 * nr * bh * itemsize + 2 * nr * bh * 4

    if force_two_phase or footprint > budget:
        out = _norm_cols_two_phase(x, weight, bias, mean_scale, eps=eps,
                                   n_samples=n_samples, group_width=group_width)
    else:
        vmem_limit = min(cap * 3 // 4, max(32 << 20, footprint + (8 << 20)))
        out = _norm_cols_single_pass(x, weight, bias, mean_scale, eps=eps,
                                     n_samples=n_samples, group_width=group_width,
                                     bh=bh, vmem_limit=vmem_limit)
    if folded:
        out = out.reshape(n, h)
    return out


# ----------------------------- Module-level forward ----------------------------------

def norm_forward(norm_type, tensor, params):
    if norm_type == 'gn':
        return _norm_cols(tensor, params['weight'], params['bias'],
                          params['mean_scale'], eps=1e-6)
    elif norm_type == 'bn':
        # "hidden matches shape[2]" branch: BN over channels == last axis.
        # TODO(synk): the "hidden matches shape[1]" branch is not implemented.
        b_, l_, h_ = tensor.shape
        x2 = tensor.reshape(b_ * l_, h_)
        ones = jnp.ones((h_,), jnp.float32)
        out2 = _norm_cols(x2, params['gamma'], params['beta'], ones, eps=1e-5)
        return out2.reshape(b_, l_, h_)
    elif norm_type is None:
        return tensor
    else:
        raise NotImplementedError(norm_type)  # TODO(synk): 'rbn' not defined in source


# ----------------------------- Pure-JAX references -----------------------------------

def _col_norm_ref(x, w, b, ms, eps):
    xf = x.astype(jnp.float32)
    mean = jnp.mean(xf, axis=0, keepdims=True)
    sub = xf - mean * ms
    std = jnp.sqrt(jnp.mean(sub * sub, axis=0, keepdims=True) + eps)
    return (w * sub / std + b).astype(x.dtype)


def _batch_norm_ref(x, g, b):
    xf = x.astype(jnp.float32)
    mean = jnp.mean(xf, axis=(0, 1), keepdims=True)
    var = jnp.mean((xf - mean) ** 2, axis=(0, 1), keepdims=True)
    return (g * (xf - mean) / jnp.sqrt(var + 1e-5) + b).astype(x.dtype)


if __name__ == "__main__":
    key = jax.random.PRNGKey(0)
    k1, k2, k3, k4, k5, k6, k7, k8 = jax.random.split(key, 8)

    hidden_dim = 32

    # --- 'gn' (GraphNorm): 8 nodes, 32 features -> lane-dense folded single-pass ---
    x_gn = jax.random.normal(k1, (8, hidden_dim), dtype=jnp.float32)
    gn_params = {
        'weight': jnp.ones((hidden_dim,), jnp.float32)
                  + 0.1 * jax.random.normal(k2, (hidden_dim,), jnp.float32),
        'bias': 0.1 * jax.random.normal(k3, (hidden_dim,), jnp.float32),
        'mean_scale': jnp.ones((hidden_dim,), jnp.float32),
    }
    out_gn = norm_forward('gn', x_gn, gn_params)
    jax.block_until_ready(out_gn)
    ref_gn = _col_norm_ref(x_gn, gn_params['weight'], gn_params['bias'],
                           gn_params['mean_scale'], 1e-6)
    assert out_gn.shape == x_gn.shape
    assert jnp.allclose(out_gn, ref_gn, atol=1e-5, rtol=1e-5)

    # --- 'bn' (BatchNorm1d, swapped branch): (batch=2, seq=8, hidden=32) ---
    x_bn = jax.random.normal(k4, (2, 8, hidden_dim), dtype=jnp.float32)
    bn_params = {
        'gamma': jnp.ones((hidden_dim,), jnp.float32),
        'beta': jnp.zeros((hidden_dim,), jnp.float32),
    }
    out_bn = norm_forward('bn', x_bn, bn_params)
    jax.block_until_ready(out_bn)
    ref_bn = _batch_norm_ref(x_bn, bn_params['gamma'], bn_params['beta'])
    assert out_bn.shape == x_bn.shape
    assert jnp.allclose(out_bn, ref_bn, atol=1e-5, rtol=1e-5)

    # --- unfolded single-pass path with H split into 2 parallel blocks ---
    x_sp = jax.random.normal(k5, (64, 256), dtype=jnp.float32)
    w_sp = jnp.ones((256,), jnp.float32) + 0.05 * jax.random.normal(k6, (256,), jnp.float32)
    b_sp = 0.1 * jax.random.normal(k7, (256,), jnp.float32)
    ms_sp = jnp.ones((256,), jnp.float32)
    out_sp = _norm_cols(x_sp, w_sp, b_sp, ms_sp, eps=1e-6)
    jax.block_until_ready(out_sp)
    ref_sp = _col_norm_ref(x_sp, w_sp, b_sp, ms_sp, 1e-6)
    assert jnp.allclose(out_sp, ref_sp, atol=1e-4, rtol=1e-4)

    # --- two-phase (large-N) path, forced, with a non-divisible row count ---
    x_big = jax.random.normal(k8, (2500, 256), dtype=jnp.float32)
    out_big = _norm_cols(x_big, w_sp, b_sp, ms_sp, eps=1e-6, force_two_phase=True)
    jax.block_until_ready(out_big)
    ref_big = _col_norm_ref(x_big, w_sp, b_sp, ms_sp, 1e-6)
    assert out_big.shape == x_big.shape
    assert jnp.allclose(out_big, ref_big, atol=1e-3, rtol=1e-3)

    # --- norm is None: identity passthrough ---
    out_id = norm_forward(None, x_gn, {})
    jax.block_until_ready(out_id)
    assert jnp.array_equal(out_id, x_gn)

    print("KERNEL_OK")
</pallas_src>

<mosaic_0001>
module attributes {stable_mosaic.version = 11 : i64} {
  func.func @_norm_cols_kernel(%arg0: i32, %arg1: memref<2x128xf32, #tpu.memory_space<vmem>>, %arg2: memref<1x128xf32, #tpu.memory_space<vmem>>, %arg3: memref<1x128xf32, #tpu.memory_space<vmem>>, %arg4: memref<1x128xf32, #tpu.memory_space<vmem>>, %arg5: memref<2x128xf32, #tpu.memory_space<vmem>>) attributes {dimension_semantics = [#tpu.dimension_semantics<parallel>], iteration_bounds = array<i64: 1>, scalar_prefetch = 0 : i64, scratch_operands = 0 : i64, tpu.core_type = #tpu.core_type<tc>, window_params = [{transform_indices = @transform_0, window_bounds = array<i64: 2, 128>}, {transform_indices = @transform_1, window_bounds = array<i64: 1, 128>}, {transform_indices = @transform_2, window_bounds = array<i64: 1, 128>}, {transform_indices = @transform_3, window_bounds = array<i64: 1, 128>}, {transform_indices = @transform_4, window_bounds = array<i64: 2, 128>}]} {
    %c0 = arith.constant 0 : index
    %c0_0 = arith.constant 0 : index
    %0 = vector.load %arg1[%c0, %c0_0] : memref<2x128xf32, #tpu.memory_space<vmem>>, vector<2x128xf32>
    %c0_1 = arith.constant 0 : index
    %c0_2 = arith.constant 0 : index
    %1 = vector.load %arg2[%c0_1, %c0_2] : memref<1x128xf32, #tpu.memory_space<vmem>>, vector<1x128xf32>
    %c0_3 = arith.constant 0 : index
    %c0_4 = arith.constant 0 : index
    %2 = vector.load %arg3[%c0_3, %c0_4] : memref<1x128xf32, #tpu.memory_space<vmem>>, vector<1x128xf32>
    %c0_5 = arith.constant 0 : index
    %c0_6 = arith.constant 0 : index
    %3 = vector.load %arg4[%c0_5, %c0_6] : memref<1x128xf32, #tpu.memory_space<vmem>>, vector<1x128xf32>
    %cst = arith.constant dense<0.000000e+00> : vector<128xf32>
    %4 = vector.multi_reduction <add>, %0, %cst [0] : vector<2x128xf32> to vector<128xf32>
    %5 = vector.shape_cast %4 : vector<128xf32> to vector<1x128xf32>
    %6 = arith.mulf %0, %0 : vector<2x128xf32>
    %cst_7 = arith.constant dense<0.000000e+00> : vector<128xf32>
    %7 = vector.multi_reduction <add>, %6, %cst_7 [0] : vector<2x128xf32> to vector<128xf32>
    %8 = vector.shape_cast %7 : vector<128xf32> to vector<1x128xf32>
    %c32_i32 = arith.constant 32 : i32
    %9 = tpu.dynamic_rotate %5 by %c32_i32 dim 1 : vector<1x128xf32>, i32 -> vector<1x128xf32>
    %10 = arith.addf %5, %9 : vector<1x128xf32>
    %c64_i32 = arith.constant 64 : i32
    %11 = tpu.dynamic_rotate %10 by %c64_i32 dim 1 : vector<1x128xf32>, i32 -> vector<1x128xf32>
    %12 = arith.addf %10, %11 : vector<1x128xf32>
    %c32_i32_8 = arith.constant 32 : i32
    %13 = tpu.dynamic_rotate %8 by %c32_i32_8 dim 1 : vector<1x128xf32>, i32 -> vector<1x128xf32>
    %14 = arith.addf %8, %13 : vector<1x128xf32>
    %c64_i32_9 = arith.constant 64 : i32
    %15 = tpu.dynamic_rotate %14 by %c64_i32_9 dim 1 : vector<1x128xf32>, i32 -> vector<1x128xf32>
    %16 = arith.addf %14, %15 : vector<1x128xf32>
    %cst_10 = arith.constant 1.250000e-01 : f32
    %17 = vector.broadcast %cst_10 : f32 to vector<1x128xf32>
    %18 = arith.mulf %12, %17 : vector<1x128xf32>
    %cst_11 = arith.constant 1.250000e-01 : f32
    %19 = vector.broadcast %cst_11 : f32 to vector<1x128xf32>
    %20 = arith.mulf %16, %19 : vector<1x128xf32>
    %21 = arith.mulf %18, %3 : vector<1x128xf32>
    %cst_12 = arith.constant 2.000000e+00 : f32
    %22 = vector.broadcast %cst_12 : f32 to vector<1x128xf32>
    %23 = arith.mulf %22, %21 : vector<1x128xf32>
    %24 = arith.mulf %23, %18 : vector<1x128xf32>
    %25 = arith.subf %20, %24 : vector<1x128xf32>
    %26 = arith.mulf %21, %21 : vector<1x128xf32>
    %27 = arith.addf %25, %26 : vector<1x128xf32>
    %cst_13 = arith.constant 0.000000e+00 : f32
    %28 = vector.broadcast %cst_13 : f32 to vector<1x128xf32>
    %29 = arith.maximumf %27, %28 : vector<1x128xf32>
    %cst_14 = arith.constant 9.99999997E-7 : f32
    %30 = vector.broadcast %cst_14 : f32 to vector<1x128xf32>
    %31 = arith.addf %29, %30 : vector<1x128xf32>
    %32 = math.rsqrt %31 : vector<1x128xf32>
    %33 = arith.mulf %1, %32 : vector<1x128xf32>
    %34 = arith.mulf %33, %21 : vector<1x128xf32>
    %35 = arith.subf %2, %34 : vector<1x128xf32>
    %36 = vector.broadcast %33 : vector<1x128xf32> to vector<2x128xf32>
    %37 = arith.mulf %0, %36 : vector<2x128xf32>
    %38 = vector.broadcast %35 : vector<1x128xf32> to vector<2x128xf32>
    %39 = arith.addf %37, %38 : vector<2x128xf32>
    %c0_15 = arith.constant 0 : index
    %c0_16 = arith.constant 0 : index
    %40 = vector.load %arg5[%c0_15, %c0_16] : memref<2x128xf32, #tpu.memory_space<vmem>>, vector<2x128xf32>
    tpu.vector_store %arg5[%c0_15, %c0_16], %39 {strides = array<i32>} : memref<2x128xf32, #tpu.memory_space<vmem>>, vector<2x128xf32>,
    return
  }
  func.func @transform_0(%arg0: i32) -> (i32, i32) {
    %c0_i32 = arith.constant 0 : i32
    %c0_i32_0 = arith.constant 0 : i32
    return %c0_i32, %arg0 : i32, i32
  }
  func.func @transform_1(%arg0: i32) -> (i32, i32) {
    %c0_i32 = arith.constant 0 : i32
    %c0_i32_0 = arith.constant 0 : i32
    return %c0_i32, %arg0 : i32, i32
  }
  func.func @transform_2(%arg0: i32) -> (i32, i32) {
    %c0_i32 = arith.constant 0 : i32
    %c0_i32_0 = arith.constant 0 : i32
    return %c0_i32, %arg0 : i32, i32
  }
  func.func @transform_3(%arg0: i32) -> (i32, i32) {
    %c0_i32 = arith.constant 0 : i32
    %c0_i32_0 = arith.constant 0 : i32
    return %c0_i32, %arg0 : i32, i32
  }
  func.func @transform_4(%arg0: i32) -> (i32, i32) {
    %c0_i32 = arith.constant 0 : i32
    %c0_i32_0 = arith.constant 0 : i32
    return %c0_i32, %arg0 : i32, i32
  }
}

</mosaic_0001>

<bundles_post_ra>
// kernel: tpu_custom_call.1
= control target key start
LH: loop header
LB: loop body
LE: loop exit
PB: predicated region body
PF: predicated region fallthrough
CT: control target
= control target key end

     0   :  { %9 = vsyncpa [#allocation3], 0  ;;  %s222_s0 = inlined_call_operand.hbm [shape: f32[2,128], index: 0, kind: input, shape index: {}]   ;;  %s223_s1 = inlined_call_operand.vmem [shape: f32[1,128], index: 1, kind: input, shape index: {}]   ;;  %s224_s2 = inlined_call_operand.vmem [shape: f32[1,128], index: 2, kind: input, shape index: {}]   ;;  %s225_s3 = inlined_call_operand.vmem [shape: f32[1,128], index: 3, kind: input, shape index: {}]   ;;  %s226_s4 = inlined_call_operand.hbm [shape: f32[2,128], index: 4, kind: output, shape index: {}]  }
   0x1   :  { %10 = vsyncpa [#allocation4], 0  ;;  %s160_s15 = smov [#allocation2]   ;;  %s112_s19 = scalar_lea.hbm %s222_s0, 32 }
   0x2   :  { %s17_s16 = sshll.u32 %s160_s15, 4  ;;  %p113_p0 = scmp.ne.s32.totalorder %s222_s0, %s112_s19  ;;  %s18_s16 = int_to_ptr.vmem [resolvable:$true] %s17_s16 }
   0x3   :  { %p116_p1 = scmp.lt.u32.totalorder %s112_s19, %s222_s0 }
   0x5   :  { %p118_p2 = pnand %p116_p1, %p113_p0 }
   0x7   :  { %121 = shalt.err (!%p118_p2)
}
   0x8   :  { %s122_s24 = scalar_lea.vmem %s18_s16, 32  ;;  %p127_p4 = scmp.lt.s32.totalorder %s18_s16, %s18_s16 }
   0x9   :  { %p123_p3 = scmp.ne.s32.totalorder %s18_s16, %s122_s24  ;;  %p128_p5 = scmp.lt.s32.totalorder %s122_s24, %s122_s24 }
   0xb   :  { %p129_p6 = por %p128_p5, %p127_p4 }
   0xd   :  { %p130_p7 = pnand %p129_p6, %p123_p3 }
   0xf   :  { %133 = shalt.err (!%p130_p7)
}
  0x10   :  { %20 = dma.hbm_to_vmem [thread:$0]  %s222_s0, 32, %s18_s16, [#allocation3]  }
  0x11   :  { %156 = dma.done.wait [#allocation3], 32  }
  0x12   :  { %157 = vsyncadd [#allocation3], 4294967264  ;;  %vm34_vm0 = vcmask 1041408   ;;  %v30_v0 = vld [vmem:[#allocation2] sm:$0x3]  ;;  %s161_s27 = smov 32   ;;  %v77_v35 = vlaneseq }
  0x13   :  { %v35_v1 = vsel %vm34_vm0, %v30_v0, 0.0  ;;  %v42_v2 = vmul.f32 %v30_v0, %v30_v0  ;;  %s162_s0 = smov 64   ;;  %v33_v22 = vld [vmem:[%s225_s3] sm:$0x1]  ;;  %s163_s7 = smov [#allocation5]  }
  0x14   :  { %v36_v3 = vrot.slane %v35_v1, 4  ;;  %v78_v36 = vshrl.u32 %v77_v35, 7  ;;  %v31_v37 = vld [vmem:[%s223_s1] sm:$0x1]  ;;  %s97_s8 = sshll.u32 %s163_s7, 4  ;;  %s98_s8 = int_to_ptr.vmem [resolvable:$true] %s97_s8 }
  0x15   :  { %v43_v4 = vsel %vm34_vm0, %v42_v2, 0.0  ;;  %v32_v41 = vld [vmem:[%s224_s2] sm:$0x1]  ;;  %s134_s9 = scalar_lea.vmem %s98_s8, 32  ;;  %p139_p9 = scmp.lt.s32.totalorder %s98_s8, %s98_s8 }
  0x16   :  { %v37_v5 = vadd.f32 %v36_v3, %v35_v1  ;;  %v44_v6 = vrot.slane %v43_v4, 4  ;;  %v79_v38 = vsub.s32 0, %v78_v36  ;;  %p135_p8 = scmp.ne.s32.totalorder %s98_s8, %s134_s9  ;;  %p140_p10 = scmp.lt.s32.totalorder %s134_s9, %s134_s9 }
  0x18   :  { %v38_v7 = vrot.slane %v37_v5, 2  ;;  %v45_v8 = vadd.f32 %v44_v6, %v43_v4  ;;  %p141_p11 = por %p140_p10, %p139_p9 }
  0x1a   :  { %v39_v9 = vadd.f32 %v38_v7, %v37_v5  ;;  %v46_v10 = vrot.slane %v45_v8, 2  ;;  %p142_p12 = pnand %p141_p11, %p135_p8 }
  0x1c   :  { %v40_v11 = vrot.slane %v39_v9, 1  ;;  %v47_v12 = vadd.f32 %v46_v10, %v45_v8 }
  0x1e   :  { %v41_v13 = vadd.f32 %v40_v11, %v39_v9  ;;  %v48_v14 = vrot.slane %v47_v12, 1 }
  0x20   :  { %50 = vrot.lane.b32.xlu0 %v41_v13, %s161_s27  ;;  %v49_v15 = vadd.f32 %v48_v14, %v47_v12 }
  0x24   :  { %56 = vrot.lane.b32.xlu0 %v49_v15, %s161_s27 }
  0x92   :  { %v51_v16 = vpop.permute.xlu0 %50 }
  0x93   :  { %v52_v17 = vadd.f32 %v51_v16, %v41_v13 }
  0x95   :  { %53 = vrot.lane.b32.xlu1 %v52_v17, %s162_s0 }
  0x96   :  { %v57_v18 = vpop.permute.xlu0 %56 }
  0x97   :  { %v58_v19 = vadd.f32 %v57_v18, %v49_v15 }
  0x99   :  { %59 = vrot.lane.b32.xlu1 %v58_v19, %s162_s0 }
 0x107   :  { %v54_v20 = vpop.permute.xlu1 %53 }
 0x108   :  { %v55_v21 = vadd.f32 %v54_v20, %v52_v17 }
 0x10a   :  { %v62_v23 = vmul.f32 0.125, %v55_v21 }
 0x10b   :  { %v60_v24 = vpop.permute.xlu1 %59 }
 0x10c   :  { %v64_v25 = vmul.f32 %v62_v23, %v33_v22  ;;  %v61_v26 = vadd.f32 %v60_v24, %v58_v19 }
 0x10e   :  { %v65_v27 = vmul.f32 2.0, %v64_v25  ;;  %v63_v29 = vmul.f32 0.125, %v61_v26  ;;  %v68_v30 = vmul.f32 %v64_v25, %v64_v25 }
 0x110   :  { %v66_v28 = vmul.f32 %v65_v27, %v62_v23 }
 0x112   :  { %v67_v31 = vsub.f32 %v63_v29, %v66_v28 }
 0x114   :  { %v69_v32 = vadd.f32 %v68_v30, %v67_v31 }
 0x116   :  { %v70_v33 = vmax.f32 %v69_v32, 0.0 }
 0x118   :  { %v71_v34 = vadd.f32 1e-06, %v70_v33 }
 0x11a   :  { %110 = vrsqrt.f32 %v71_v34 }
 0x124   :  { %v111_v39 = vpop.eup %110 }
 0x125   :  { %v73_v40 = vmul.f32 %v111_v39, %v31_v37 }
 0x127   :  { %v74_v42 = vmul.f32 %v73_v40, %v64_v25  ;;  %v80_v43 = vrot.slane %v73_v40, %v79_v38 }
 0x129   :  { %v75_v44 = vsub.f32 %v32_v41, %v74_v42  ;;  %v82_v45 = vmul.f32 %v80_v43, %v30_v0 }
 0x12b   :  { %v87_v46 = vrot.slane %v75_v44, %v79_v38 }
 0x12d   :  { %v89_v47 = vadd.f32 %v87_v46, %v82_v45 }
 0x12f   :  { %90 = vst [vmem:[#allocation5] sm:$0x3] %v89_v47 }
 0x130   :  { %145 = shalt.err (!%p142_p12)
}
 0x131   :  { %s146_s2 = scalar_lea.hbm %s226_s4, 32 }
 0x132   :  { %p147_p13 = scmp.ne.s32.totalorder %s226_s4, %s146_s2  ;;  %p150_p0 = scmp.lt.u32.totalorder %s146_s2, %s226_s4 }
 0x134   :  { %p152_p1 = pnand %p150_p0, %p147_p13 }
 0x136   :  { %155 = shalt.err (!%p152_p1)
}
 0x137   :  { %100 = dma.vmem_to_hbm [thread:$0]  %s98_s8, 32, %s226_s4, [#allocation4]  }
 0x138   :  { %158 = dma.done.wait [#allocation4], 32  }
 0x139   :  { %159 = vsyncadd [#allocation4], 4294967264 }
 0x13a   :  { %104 = vsyncpa [#allocation3], 1 }
 0x13b   :  { %105 = vsyncpa [#allocation4], 1 }

</bundles_post_ra>
